<compile_context>
chip_gen: v7x
topology: tpu7x:2x2x1
jax: 0.10.0
libtpu: 0.0.40
codegen_flags: <defaults>
</compile_context>

<pallas_src>
import functools
import math

import jax
import jax.numpy as jnp
from jax.experimental import pallas as pl
from jax.experimental.pallas import tpu as pltpu


# Large finite negative for masked logits: exp() underflows to exactly 0 for any
# realistic logit, and fully-masked rows stay finite (uniform) instead of NaN.
_MASK_VALUE = -0.7 * float(jnp.finfo(jnp.float32).max)


def _attn_kernel(*refs, scale, block_g, dv, slab_out, has_mask, exact_softmax,
                 n_k_steps):
    if has_mask:
        q_ref, k_ref, v_ref, m_ref, o_ref, *scratch = refs
    else:
        q_ref, k_ref, v_ref, o_ref, *scratch = refs
        m_ref = None

    flash = n_k_steps > 1
    kv_step = pl.program_id(1)

    if flash:
        m_sc, l_sc, acc_sc = scratch

        @pl.when(kv_step == 0)
        def _():
            m_sc[...] = jnp.full_like(m_sc, -jnp.inf)
            l_sc[...] = jnp.zeros_like(l_sc)
            acc_sc[...] = jnp.zeros_like(acc_sc)

    # Softmax scale folded into Q: block_g*Sq*D multiplies instead of block_g*Sq*Bk
    # on the score tile (done in-kernel so it hides under the MXU work).
    q = q_ref[...] * scale
    k = k_ref[...]
    v = v_ref[...]

    # Batched Q @ K^T over the folded group axis; native-dtype MXU feed, f32 accum.
    s = jnp.einsum("gqd,gkd->gqk", q, k, preferred_element_type=jnp.float32)

    if has_mask:
        # Hoisted additive bias: one compare+select over the mask block per grid step;
        # a shared (1, Sq, Bk) mask broadcasts over the group axis of `s` for free.
        bias = jnp.where(m_ref[...] == 0, jnp.float32(_MASK_VALUE), jnp.float32(0.0))
        s = s + bias

    def _store(acc, denom):
        if exact_softmax:
            out = acc / denom
        else:
            out = acc * pl.reciprocal(denom, approx=True)   # EUP slot, off the VALU
        if slab_out:
            # Lane-dense (Sq, block_g*Dv) slab: per-group static slice stores free each
            # group's registers as soon as it is written (no concat temporary).
            for grp in range(block_g):
                o_ref[:, grp * dv:(grp + 1) * dv] = out[grp].astype(o_ref.dtype)
        else:
            o_ref[...] = out.astype(o_ref.dtype)

    if not flash:
        # Single K step: plain softmax, no scratch round-trips.
        m_cur = jnp.max(s, axis=-1, keepdims=True)
        p = jnp.exp(s - m_cur)
        denom = jnp.sum(p, axis=-1, keepdims=True)
        acc = jnp.einsum("gqk,gkd->gqd", p.astype(v.dtype), v,
                         preferred_element_type=jnp.float32)
        _store(acc, denom)
    else:
        # Online softmax (flash) across the K grid axis.
        m_prev = m_sc[...]
        m_new = jnp.maximum(m_prev, jnp.max(s, axis=-1, keepdims=True))
        alpha = jnp.exp(m_prev - m_new)
        p = jnp.exp(s - m_new)
        l_sc[...] = alpha * l_sc[...] + jnp.sum(p, axis=-1, keepdims=True)
        acc_sc[...] = alpha * acc_sc[...] + jnp.einsum(
            "gqk,gkd->gqd", p.astype(v.dtype), v, preferred_element_type=jnp.float32)
        m_sc[...] = m_new

        @pl.when(kv_step == n_k_steps - 1)
        def _():
            _store(acc_sc[...], l_sc[...])


def _step_vmem_bytes(bg, sq, bk, d, dv, itemsize, mask_groups):
    """Per-grid-step VMEM footprint (double-buffered blocks + f32 temporaries)."""
    db = 2                                              # pipeline double-buffering
    qkv = db * itemsize * bg * (sq * d + bk * (d + dv))
    out = db * itemsize * bg * sq * dv
    msk = db * mask_groups * sq * bk                    # int8 mask block
    tmp = 2 * 4 * bg * sq * bk                          # f32 scores + probabilities
    scr = 4 * bg * sq * (dv + 2)                        # online-softmax acc/m/l scratch
    return qkv + out + msk + tmp + scr


def _choose_tiling(g, sq, sk, d, dv, itemsize, per_group_mask, lane_pack, budget,
                   forced_block_k=None):
    """Pick (block_g, block_k) against the per-step VMEM budget."""
    bg_cap = 64 if lane_pack > 1 else 1024              # bounds the slab-store unroll
    target_steps = 4                                    # keep v7x's 2 TCs + DMA pipeline fed

    if (forced_block_k is not None and 0 < forced_block_k <= sk
            and sk % forced_block_k == 0
            and (forced_block_k == sk or forced_block_k % 128 == 0)):
        k_candidates = [forced_block_k]
    else:
        k_candidates = [sk] + [c for c in (4096, 2048, 1024, 512, 256, 128)
                               if c < sk and sk % c == 0]

    for bk in k_candidates:
        def fits(bg, bk=bk):
            mask_groups = bg if per_group_mask else 1
            return _step_vmem_bytes(bg, sq, bk, d, dv, itemsize, mask_groups) <= budget

        if not fits(lane_pack):
            continue                                    # shrink the K tile instead
        bg = lane_pack
        bg_max = min(bg_cap, max(g, lane_pack))
        while bg + lane_pack <= bg_max and fits(bg + lane_pack):
            bg += lane_pack
        # Keep >= target_steps parallel group-steps when there is enough work.
        while bg > lane_pack and pl.cdiv(g, bg) < target_steps:
            bg -= lane_pack
        # Prefer a block_g that divides g: avoids a jnp.pad copy of Q/K/V through HBM.
        for cand in range(bg, lane_pack - 1, -lane_pack):
            if g % cand == 0:
                return cand, bk
        return bg, bk

    # Even a single lane-pack of groups with the smallest K tile exceeds the budget;
    # fall back to minimal tiles and rely on the raised vmem_limit.
    fallback_bk = 128 if (sk % 128 == 0 and sk > 128) else sk
    return lane_pack, fallback_bk


def scaled_dot_product_attention(query, key, value, attn_mask=None, scale=None, *,
                                 exact_softmax=False, block_k=None):
    """Pallas TPU equivalent of the PyTorch module's forward.

    Mask semantics follow the module exactly (masked_fill(attn_mask == 0, -inf)):
    positions where attn_mask == 0 are masked out, regardless of the mask dtype.
    exact_softmax=True replaces the EUP approximate reciprocal with an exact divide
    (strict parity for training); block_k optionally overrides the K tile size.
    """
    *batch_dims, sq, d = query.shape
    sk = key.shape[-2]
    dv = value.shape[-1]
    scale_factor = float(1.0 / math.sqrt(d)) if scale is None else float(scale)
    g = math.prod(batch_dims)

    qf = query.reshape(g, sq, d)
    kf = key.reshape(g, sk, d)
    vf = value.reshape(g, sk, dv)

    has_mask = attn_mask is not None
    per_group_mask = False
    mbits = None
    if has_mask:
        mbits = (jnp.asarray(attn_mask) != 0).astype(jnp.int8)   # 1 = keep, 0 = masked
        if mbits.ndim < 2:
            mbits = jnp.broadcast_to(mbits, (sq, sk))
        per_group_mask = any(sdim != 1 for sdim in mbits.shape[:-2])

    # Generation-aware VMEM budget (v5e/v6e: 128 MiB physical, v7x: 64 MiB).
    try:
        vmem_cap = int(pltpu.get_tpu_info().vmem_capacity_bytes)
    except Exception:
        vmem_cap = 64 * 1024 * 1024                     # conservative (v7x-sized) fallback
    vmem_limit = min(vmem_cap // 2, 48 * 1024 * 1024)
    step_budget = (3 * vmem_limit) // 4                 # headroom for compiler scratch

    itemsize = jnp.dtype(query.dtype).itemsize
    slab_out = (dv % 128 != 0)
    lane_pack = (128 // math.gcd(dv, 128)) if slab_out else 1

    block_g, bk = _choose_tiling(g, sq, sk, d, dv, itemsize, per_group_mask,
                                 lane_pack, step_budget, forced_block_k=block_k)

    g_pad = pl.cdiv(g, block_g) * block_g
    if g_pad != g:      # only when no suitable divisor of g exists (rare; extra HBM copy)
        pad = ((0, g_pad - g), (0, 0), (0, 0))
        qf, kf, vf = jnp.pad(qf, pad), jnp.pad(kf, pad), jnp.pad(vf, pad)

    n_g = g_pad // block_g
    n_k = sk // bk
    grid = (n_g, n_k)

    q_spec = pl.BlockSpec((block_g, sq, d), lambda i, kv: (i, 0, 0))
    k_spec = pl.BlockSpec((block_g, bk, d), lambda i, kv: (i, kv, 0))
    v_spec = pl.BlockSpec((block_g, bk, dv), lambda i, kv: (i, kv, 0))
    in_specs = [q_spec, k_spec, v_spec]
    args = [qf, kf, vf]

    if has_mask:
        if per_group_mask:
            mf = jnp.broadcast_to(mbits, tuple(batch_dims) + (sq, sk)).reshape(g, sq, sk)
            if g_pad != g:
                mf = jnp.pad(mf, ((0, g_pad - g), (0, 0), (0, 0)), constant_values=1)
            m_spec = pl.BlockSpec((block_g, sq, bk), lambda i, kv: (i, 0, kv))
        else:
            # Shared mask at its natural (Sq, Sk) shape; with a single K step the
            # constant index_map keeps it VMEM-resident across all group steps.
            # (pipeline_mode=pl.Buffered(1) would drop its second buffer; left at the
            # default for portability.)
            mf = jnp.broadcast_to(mbits.reshape(mbits.shape[-2:]), (sq, sk))
            mf = mf.reshape(1, sq, sk)
            m_spec = pl.BlockSpec((1, sq, bk), lambda i, kv: (0, 0, kv))
        in_specs.append(m_spec)
        args.append(mf)

    if slab_out:
        out_shape = jax.ShapeDtypeStruct((sq, g_pad * dv), query.dtype)
        o_spec = pl.BlockSpec((sq, block_g * dv), lambda i, kv: (0, i))
    else:
        out_shape = jax.ShapeDtypeStruct((g_pad, sq, dv), query.dtype)
        o_spec = pl.BlockSpec((block_g, sq, dv), lambda i, kv: (i, 0, 0))

    scratch_shapes = []
    if n_k > 1:          # online-softmax carries (m, l, acc) across the K grid axis
        scratch_shapes = [pltpu.VMEM((block_g, sq, 1), jnp.float32),
                          pltpu.VMEM((block_g, sq, 1), jnp.float32),
                          pltpu.VMEM((block_g, sq, dv), jnp.float32)]

    kernel = functools.partial(
        _attn_kernel, scale=scale_factor, block_g=block_g, dv=dv, slab_out=slab_out,
        has_mask=has_mask, exact_softmax=exact_softmax, n_k_steps=n_k)

    out = pl.pallas_call(
        kernel,
        out_shape=out_shape,
        grid_spec=pltpu.PrefetchScalarGridSpec(
            num_scalar_prefetch=0,
            grid=grid,
            in_specs=in_specs,
            out_specs=o_spec,
            scratch_shapes=scratch_shapes),
        compiler_params=pltpu.CompilerParams(
            dimension_semantics=("parallel", "arbitrary"),
            vmem_limit_bytes=vmem_limit),
    )(*args)

    if slab_out:
        # (Sq, G_pad*Dv) -> (*batch, Sq, Dv): layout plumbing outside the kernel, only
        # needed when Dv < 128 (lane-dense slab stores).
        out = out.reshape(sq, g_pad, dv)[:, :g]
        out = jnp.transpose(out, (1, 0, 2))
    else:
        out = out[:g]
    return out.reshape(tuple(batch_dims) + (sq, dv))


def _reference(query, key, value, attn_mask=None, scale=None):
    scale_factor = (1.0 / math.sqrt(query.shape[-1])) if scale is None else scale
    attn = jnp.einsum("...qd,...kd->...qk", query, key) * scale_factor
    if attn_mask is not None:
        attn = jnp.where(attn_mask == 0, -jnp.inf, attn)
    probs = jax.nn.softmax(attn, axis=-1)
    return jnp.einsum("...qk,...kd->...qd", probs, value)


if __name__ == "__main__":
    root = jax.random.PRNGKey(0)
    kq, kk, kv0, kv1, kq2, kk2, kv2, klen = jax.random.split(root, 8)
    tol = dict(atol=2e-2, rtol=2e-2)   # absorbs the EUP approximate reciprocal

    # 1) No mask; Dv < 128 -> lane-dense slab output path, single K step.
    B, H, S, D = 2, 4, 8, 32
    q = jax.random.normal(kq, (B, H, S, D), dtype=jnp.float32)
    k = jax.random.normal(kk, (B, H, S, D), dtype=jnp.float32)
    v = jax.random.normal(kv0, (B, H, S, D), dtype=jnp.float32)
    out = scaled_dot_product_attention(q, k, v)
    jax.block_until_ready(out)
    ref = _reference(q, k, v)
    assert out.shape == ref.shape, (out.shape, ref.shape)
    assert jnp.allclose(out, ref, **tol), "no-mask mismatch"

    # 2) Shared causal mask (VMEM-resident mask block, hoisted additive bias).
    causal = jnp.tril(jnp.ones((S, S), dtype=jnp.int32))
    out_m = scaled_dot_product_attention(q, k, v, attn_mask=causal)
    jax.block_until_ready(out_m)
    ref_m = _reference(q, k, v, attn_mask=causal)
    assert jnp.allclose(out_m, ref_m, **tol), "masked mismatch"

    # 3) Dv a multiple of 128 -> natural-layout output (no wrapper transpose).
    v_wide = jax.random.normal(kv1, (B, H, S, 128), dtype=jnp.float32)
    out_w = scaled_dot_product_attention(q, k, v_wide)
    jax.block_until_ready(out_w)
    ref_w = _reference(q, k, v_wide)
    assert out_w.shape == ref_w.shape, (out_w.shape, ref_w.shape)
    assert jnp.allclose(out_w, ref_w, **tol), "natural-layout mismatch"

    # 4) Sk-tiled online-softmax (flash) path with a per-group key-padding mask.
    SK = 256
    q4 = jax.random.normal(kq2, (B, H, S, D), dtype=jnp.float32)
    k4 = jax.random.normal(kk2, (B, H, SK, D), dtype=jnp.float32)
    v4 = jax.random.normal(kv2, (B, H, SK, D), dtype=jnp.float32)
    lens = jax.random.randint(klen, (B, H), 1, SK + 1)
    pad_mask = (jnp.arange(SK)[None, None, None, :]
                < lens[:, :, None, None]).astype(jnp.int32)
    out_f = scaled_dot_product_attention(q4, k4, v4, attn_mask=pad_mask, block_k=128)
    jax.block_until_ready(out_f)
    ref_f = _reference(q4, k4, v4, attn_mask=pad_mask)
    assert jnp.allclose(out_f, ref_f, **tol), "flash-path mismatch"

    print("KERNEL_OK")
</pallas_src>

<mosaic_0001>
module attributes {stable_mosaic.version = 11 : i64} {
  func.func @_attn_kernel(%arg0: i32, %arg1: i32, %arg2: memref<4x8x32xf32, #tpu.memory_space<vmem>>, %arg3: memref<4x8x32xf32, #tpu.memory_space<vmem>>, %arg4: memref<4x8x32xf32, #tpu.memory_space<vmem>>, %arg5: memref<8x128xf32, #tpu.memory_space<vmem>>) attributes {dimension_semantics = [#tpu.dimension_semantics<parallel>, #tpu.dimension_semantics<arbitrary>], iteration_bounds = array<i64: 2, 1>, scalar_prefetch = 0 : i64, scratch_operands = 0 : i64, tpu.core_type = #tpu.core_type<tc>, window_params = [{transform_indices = @transform_0, window_bounds = array<i64: 4, 8, 32>}, {transform_indices = @transform_1, window_bounds = array<i64: 4, 8, 32>}, {transform_indices = @transform_2, window_bounds = array<i64: 4, 8, 32>}, {transform_indices = @transform_3, window_bounds = array<i64: 8, 128>}]} {
    %c0 = arith.constant 0 : index
    %c0_0 = arith.constant 0 : index
    %c0_1 = arith.constant 0 : index
    %0 = vector.load %arg2[%c0, %c0_0, %c0_1] : memref<4x8x32xf32, #tpu.memory_space<vmem>>, vector<4x8x32xf32>
    %cst = arith.constant 0.176776692 : f32
    %1 = vector.broadcast %cst : f32 to vector<4x8x32xf32>
    %2 = arith.mulf %0, %1 : vector<4x8x32xf32>
    %c0_2 = arith.constant 0 : index
    %c0_3 = arith.constant 0 : index
    %c0_4 = arith.constant 0 : index
    %3 = vector.load %arg3[%c0_2, %c0_3, %c0_4] : memref<4x8x32xf32, #tpu.memory_space<vmem>>, vector<4x8x32xf32>
    %c0_5 = arith.constant 0 : index
    %c0_6 = arith.constant 0 : index
    %c0_7 = arith.constant 0 : index
    %4 = vector.load %arg4[%c0_5, %c0_6, %c0_7] : memref<4x8x32xf32, #tpu.memory_space<vmem>>, vector<4x8x32xf32>
    "tpu.trace_start"() <{level = 10 : i32, message = "gqd,gkd->gqk"}> : () -> ()
    %cst_8 = arith.constant dense<0.000000e+00> : vector<4x8x8xf32>
    %5 = tpu.matmul %2, %3, %cst_8 {dimension_numbers = #tpu.dot_dimension_numbers<[2], [2], [1], [1], [0, 0, 0, 1, 1, 1], [0], [0]>} : vector<4x8x32xf32>, vector<4x8x32xf32>, vector<4x8x8xf32> -> vector<4x8x8xf32>
    "tpu.trace_stop"() : () -> ()
    %cst_9 = arith.constant dense<0xFF800000> : vector<4x8xf32>
    %6 = vector.multi_reduction <maximumf>, %5, %cst_9 [2] : vector<4x8x8xf32> to vector<4x8xf32>
    %7 = vector.shape_cast %6 : vector<4x8xf32> to vector<4x8x1xf32>
    %8 = vector.broadcast %7 : vector<4x8x1xf32> to vector<4x8x8xf32>
    %9 = arith.subf %5, %8 : vector<4x8x8xf32>
    %10 = math.exp %9 : vector<4x8x8xf32>
    %cst_10 = arith.constant dense<0.000000e+00> : vector<4x8xf32>
    %11 = vector.multi_reduction <add>, %10, %cst_10 [2] : vector<4x8x8xf32> to vector<4x8xf32>
    %12 = vector.shape_cast %11 : vector<4x8xf32> to vector<4x8x1xf32>
    "tpu.trace_start"() <{level = 10 : i32, message = "gqk,gkd->gqd"}> : () -> ()
    %cst_11 = arith.constant dense<0.000000e+00> : vector<4x8x32xf32>
    %13 = tpu.matmul %10, %4, %cst_11 {dimension_numbers = #tpu.dot_dimension_numbers<[2], [1], [1], [2], [0, 0, 0, 1, 1, 2], [0], [0]>} : vector<4x8x8xf32>, vector<4x8x32xf32>, vector<4x8x32xf32> -> vector<4x8x32xf32>
    "tpu.trace_stop"() : () -> ()
    %14 = tpu.reciprocal %12 {approx = true} : vector<4x8x1xf32> -> vector<4x8x1xf32>
    %15 = vector.broadcast %14 : vector<4x8x1xf32> to vector<4x8x32xf32>
    %16 = arith.mulf %13, %15 : vector<4x8x32xf32>
    %17 = vector.extract_strided_slice %16 {offsets = [0, 0, 0], sizes = [1, 8, 32], strides = [1, 1, 1]} : vector<4x8x32xf32> to vector<1x8x32xf32>
    %18 = vector.shape_cast %17 : vector<1x8x32xf32> to vector<8x32xf32>
    %c0_12 = arith.constant 0 : index
    %c0_13 = arith.constant 0 : index
    %19 = vector.load %arg5[%c0_12, %c0_13] : memref<8x128xf32, #tpu.memory_space<vmem>>, vector<8x32xf32>
    tpu.vector_store %arg5[%c0_12, %c0_13], %18 {strides = array<i32>} : memref<8x128xf32, #tpu.memory_space<vmem>>, vector<8x32xf32>,
    %20 = vector.extract_strided_slice %16 {offsets = [1, 0, 0], sizes = [1, 8, 32], strides = [1, 1, 1]} : vector<4x8x32xf32> to vector<1x8x32xf32>
    %21 = vector.shape_cast %20 : vector<1x8x32xf32> to vector<8x32xf32>
    %c0_14 = arith.constant 0 : index
    %c32 = arith.constant 32 : index
    %22 = vector.load %arg5[%c0_14, %c32] : memref<8x128xf32, #tpu.memory_space<vmem>>, vector<8x32xf32>
    tpu.vector_store %arg5[%c0_14, %c32], %21 {strides = array<i32>} : memref<8x128xf32, #tpu.memory_space<vmem>>, vector<8x32xf32>,
    %23 = vector.extract_strided_slice %16 {offsets = [2, 0, 0], sizes = [1, 8, 32], strides = [1, 1, 1]} : vector<4x8x32xf32> to vector<1x8x32xf32>
    %24 = vector.shape_cast %23 : vector<1x8x32xf32> to vector<8x32xf32>
    %c0_15 = arith.constant 0 : index
    %c64 = arith.constant 64 : index
    %25 = vector.load %arg5[%c0_15, %c64] : memref<8x128xf32, #tpu.memory_space<vmem>>, vector<8x32xf32>
    tpu.vector_store %arg5[%c0_15, %c64], %24 {strides = array<i32>} : memref<8x128xf32, #tpu.memory_space<vmem>>, vector<8x32xf32>,
    %26 = vector.extract_strided_slice %16 {offsets = [3, 0, 0], sizes = [1, 8, 32], strides = [1, 1, 1]} : vector<4x8x32xf32> to vector<1x8x32xf32>
    %27 = vector.shape_cast %26 : vector<1x8x32xf32> to vector<8x32xf32>
    %c0_16 = arith.constant 0 : index
    %c96 = arith.constant 96 : index
    %28 = vector.load %arg5[%c0_16, %c96] : memref<8x128xf32, #tpu.memory_space<vmem>>, vector<8x32xf32>
    tpu.vector_store %arg5[%c0_16, %c96], %27 {strides = array<i32>} : memref<8x128xf32, #tpu.memory_space<vmem>>, vector<8x32xf32>,
    return
  }
  func.func @transform_0(%arg0: i32, %arg1: i32) -> (i32, i32, i32) {
    %c0_i32 = arith.constant 0 : i32
    %c0_i32_0 = arith.constant 0 : i32
    %c0_i32_1 = arith.constant 0 : i32
    return %arg0, %c0_i32, %c0_i32_0 : i32, i32, i32
  }
  func.func @transform_1(%arg0: i32, %arg1: i32) -> (i32, i32, i32) {
    %c0_i32 = arith.constant 0 : i32
    %c0_i32_0 = arith.constant 0 : i32
    return %arg0, %arg1, %c0_i32 : i32, i32, i32
  }
  func.func @transform_2(%arg0: i32, %arg1: i32) -> (i32, i32, i32) {
    %c0_i32 = arith.constant 0 : i32
    %c0_i32_0 = arith.constant 0 : i32
    return %arg0, %arg1, %c0_i32 : i32, i32, i32
  }
  func.func @transform_3(%arg0: i32, %arg1: i32) -> (i32, i32) {
    %c0_i32 = arith.constant 0 : i32
    %c0_i32_0 = arith.constant 0 : i32
    return %c0_i32, %arg0 : i32, i32
  }
}

</mosaic_0001>

<bundles_post_ra>
// kernel: tpu_custom_call.1
= control target key start
LH: loop header
LB: loop body
LE: loop exit
PB: predicated region body
PF: predicated region fallthrough
CT: control target
= control target key end

     0   :  { %s1831_s0 = inlined_call_operand.hbm [shape: f32[8,8,32], index: 0, kind: input, shape index: {}]   ;;  %s1832_s1 = inlined_call_operand.hbm [shape: f32[8,8,32], index: 1, kind: input, shape index: {}]   ;;  %s1833_s2 = inlined_call_operand.hbm [shape: f32[8,8,32], index: 2, kind: input, shape index: {}]   ;;  %s1834_s3 = inlined_call_operand.hbm [shape: f32[8,256], index: 3, kind: output, shape index: {}]  }
   0x1   :  { %1844 = sst [smem:[#allocation15_spill]] %s1832_s1 }
   0x2   :  { %8 = vsyncpa [#allocation3], 0 }
   0x3   :  { %10 = vsyncpa [#allocation3 + $0x1], 0 }
   0x4   :  { %11 = vsyncpa [#allocation6], 0 }
   0x5   :  { %13 = vsyncpa [#allocation6 + $0x1], 0 }
   0x6   :  { %14 = vsyncpa [#allocation4], 0 }
   0x7   :  { %16 = vsyncpa [#allocation4 + $0x1], 0  ;;  %s1497_s12 = smov 0   ;;  %s1499_s13 = smov 0  }
   0x8   :  { %s1501_s14 = smov 0   ;;  %s1503_s15 = smov 0  }
   0x9   :  { %s1505_s16 = smov 0   ;;  %s1507_s17 = smov 0  }
   0xa LB: > { %1845 = sst [smem:[#allocation12_spill]] %s1460_s16  ;;  %s1528_s18 = sadd.s32 4294967295, %s1464_s17   ;;  %s1464_s17 = sphi %s1507_s17, %s22_s17   ;;  %s1460_s16 = sphi %s1505_s16, %s1868_s16   ;;  %s1456_s15 = sphi %s1503_s15, %s1867_s15   ;;  %s1452_s14 = sphi %s1501_s14, %s1871_s14   ;;  %s1448_s13 = sphi %s1499_s13, %s1870_s13   ;;  %s1444_s12 = sphi %s1497_s12, %s1869_s12  }
   0xb   : > { %s1101_s19 = sadd.s32 4294967294, %s1464_s17   ;;  %s34_s20 = sadd.s32 1, %s1460_s16 }
   0xc   : > { %s41_s21 = sadd.s32 1, %s1452_s14  ;;  %p36_p0 = scmp.ge.s32.totalorder %s34_s20, 2 }
   0xd   : > { %p48_p1 = scmp.ne.s32.totalorder %s1452_s14, %s1448_s13  ;;  %p49_p2 = scmp.eq.s32.totalorder %s1464_s17, 0 }
   0xe   : > { %p54_p3 = scmp.ne.s32.totalorder %s1448_s13, %s1444_s12  ;;  %s1873_s20 = smov (%p36_p0, %s34_s20), 0 }
   0xf   : > { %1846 = sst [smem:[#allocation13_spill]] %s1873_s20  ;;  %p1540_p4 = por %p49_p2, %p48_p1 }
  0x10   : > { %p55_p5 = scmp.eq.s32.totalorder %s1528_s18, 0  ;;  %s38_s23 = ssub.s32 %s1460_s16, %s1873_s20 }
  0x11   : > { %p134_p6 = scmp.eq.s32.totalorder %s1528_s18, 1  ;;  %p39_p7 = scmp.eq.s32.totalorder %s38_s23, 0 }
  0x12   : > { %p1548_p8 = por %p55_p5, %p54_p3  ;;  %p140_p10 = scmp.eq.s32.totalorder %s1101_s19, 1 }
  0x13   : > { %p1552_p9 = por %p134_p6, %p48_p1  ;;  %p1215_p13 = scmp.lt.s32.totalorder %s1464_s17, 2 }
  0x14   : > { %s1848_s24 = scalar_select %p1548_p8, 1, 0 }
  0x15   : > { %s1849_s25 = scalar_select %p1552_p9, 1, 0 }
  0x16   : > { %s1557_s26 = scalar_select %p39_p7, %s1452_s14, %s41_s21  }
  0x17   : > { %p1559_p11 = por %p140_p10, %p54_p3  ;;  %s1837_s28 = sand.u32 1, %s1452_s14  }
  0x18   : > { %1850 = sst [smem:[#allocation14_spill]] %s1557_s26  ;;  %s1568_s29 = sshll.u32 %s1837_s28, 5 }
  0x19   : > { %s1851_s27 = scalar_select %p1559_p11, 1, 0 }
  0x1a   : > { %s1571_s30 = sshll.u32 %s1460_s16, 9  ;;  %p1575_p0 = pnand %p1215_p13, %p1540_p4 }
  0x1b   : > { %s181_s5 = sand.u32 1, %s1464_s17   ;;  %s1853_s1 = sld [smem:[#allocation15_spill]] }
  0x1c   : > { %s185_s9 = scalar_lea.vmem [#allocation5], %s1568_s29  ;;  %s1591_s11 = scalar_lea.sflag [#allocation6], %s181_s5 }
  0x1d   : > { %s193_s10 = sshll.u32 %s185_s9, 4  ;;  %p1597_p4 = pneg %p1575_p0  ;;  %s1588_s10 = int_to_ptr.vmem [resolvable:$true] %s193_s10 }
  0x21   : > { %s1584_s8 = scalar_lea.hbm %s1853_s1, %s1571_s30  ;;  %s1293_s6 = scalar_lea.hbm %s1853_s1, 1024 }
  0x22   : > { %s1288_s19 = scalar_lea.hbm %s1584_s8, 512  ;;  %p1294_p7 = scmp.lt.u32.totalorder %s1584_s8, %s1853_s1 }
  0x23   : > { %p1289_p3 = scmp.ne.s32.totalorder %s1584_s8, %s1288_s19  ;;  %p1295_p10 = scmp.lt.u32.totalorder %s1293_s6, %s1288_s19 }
  0x24   : > { %p1297_p12 = scmp.lt.u32.totalorder %s1288_s19, %s1584_s8 }
  0x25   : > { %p1291_p5 = pnand %p1597_p4, %p1289_p3  ;;  %p1296_p13 = por %p1295_p10, %p1294_p7 }
  0x27   : > { %p1292_p6 = pneg %p1291_p5  ;;  %p1298_p1 = por %p1297_p12, %p1296_p13 }
  0x29   : > { %p1299_p2 = pnand %p1298_p1, %p1292_p6 }
  0x2b   : > { %1302 = shalt.err (!%p1299_p2)
}
  0x2c   : > { %s1303_s5 = scalar_lea.vmem %s1588_s10, 512  ;;  %s1466_s22 = smov [#allocation5]  }
  0x2d   : > { %p1304_p3 = scmp.ne.s32.totalorder %s1588_s10, %s1303_s5  ;;  %s1308_s23 = sshll.u32 %s1466_s22, 4  ;;  %s1309_s23 = int_to_ptr.vmem [resolvable:$false] %s1308_s23 }
  0x2e   : > { %s1310_s7 = scalar_lea.vmem %s1309_s23, 1024  ;;  %p1311_p9 = scmp.lt.s32.totalorder %s1588_s10, %s1309_s23 }
  0x2f   : > { %p1306_p5 = pnand %p1304_p3, %p1597_p4  ;;  %p1312_p8 = scmp.lt.s32.totalorder %s1310_s7, %s1303_s5 }
  0x31   : > { %p1307_p11 = pneg %p1306_p5  ;;  %p1313_p7 = por %p1312_p8, %p1311_p9 }
  0x33   : > { %p1314_p10 = pnand %p1313_p7, %p1307_p11 }
  0x35   : > { %1317 = shalt.err (!%p1314_p10)
}
  0x36   : > { %s1838_s19 = smov 128   ;;  %s1840_s6 = smov 8  }
  0x37   : > { %1207 = dma.hbm_to_vmem [thread:$0]  (!%p1575_p0), %s1584_s8, 512, %s1588_s10, %s1591_s11, %s1838_s19, %s1838_s19, %s1840_s6  }
  0x38   : > { %p1855_p8 = scmp.lt.s32.totalorder %s1464_s17, 3  ;;  %p1856_p9 = scmp.ge.s32.totalorder %s1464_s17, 1 }
  0x39   : > { %s1636_s23 = scalar_lea.hbm %s1831_s0, %s1571_s30  ;;  %s164_s7 = scalar_lea.vmem [#allocation2], %s1568_s29 }
  0x3a   : > { %p1628_p11 = pnand %p1856_p9, %p1855_p8  ;;  %s171_s28 = sshll.u32 %s164_s7, 4  ;;  %s1639_s28 = int_to_ptr.vmem [resolvable:$true] %s171_s28 }
  0x3b   : > { %s1645_s19 = scalar_lea.hbm %s1833_s2, %s1571_s30  ;;  %s1858_s6 = sand.u32 1, %s1452_s14  }
  0x3c   : > { %s1857_s9 = scalar_select %p1628_p11, 1, 0 }
  0x3d   : > { %s1649_s1 = scalar_lea.sflag [#allocation3], %s1858_s6  ;;  %s1318_s20 = scalar_lea.hbm %s1636_s23, 512 }
  0x3e   : > { %p1319_p12 = scmp.ne.s32.totalorder %s1636_s23, %s1318_s20  ;;  %s1323_s16 = scalar_lea.hbm %s1831_s0, 1024 }
  0x3f   : > { %p1324_p6 = scmp.lt.u32.totalorder %s1636_s23, %s1831_s0  ;;  %p1325_p13 = scmp.lt.u32.totalorder %s1323_s16, %s1318_s20 }
  0x40   : > { %p1321_p1 = pnand %p1319_p12, %p1597_p4  ;;  %p1327_p5 = scmp.lt.u32.totalorder %s1318_s20, %s1636_s23 }
  0x41   : > { %p1326_p3 = por %p1325_p13, %p1324_p6 }
  0x42   : > { %p1322_p2 = pneg %p1321_p1 }
  0x43   : > { %p1328_p7 = por %p1327_p5, %p1326_p3 }
  0x45   : > { %p1329_p10 = pnand %p1328_p7, %p1322_p2 }
  0x47   : > { %1332 = shalt.err (!%p1329_p10)
}
  0x48   : > { %s1333_s30 = scalar_lea.vmem %s1639_s28, 512  ;;  %s1469_s6 = smov [#allocation2]  }
  0x49   : > { %p1334_p8 = scmp.ne.s32.totalorder %s1639_s28, %s1333_s30  ;;  %s1338_s8 = sshll.u32 %s1469_s6, 4  ;;  %s1339_s8 = int_to_ptr.vmem [resolvable:$false] %s1338_s8 }
  0x4a   : > { %s1340_s26 = scalar_lea.vmem %s1339_s8, 1024  ;;  %p1341_p1 = scmp.lt.s32.totalorder %s1639_s28, %s1339_s8 }
  0x4b   : > { %p1336_p9 = pnand %p1334_p8, %p1597_p4  ;;  %p1342_p11 = scmp.lt.s32.totalorder %s1340_s26, %s1333_s30 }
  0x4d   : > { %p1337_p12 = pneg %p1336_p9  ;;  %p1343_p6 = por %p1342_p11, %p1341_p1 }
  0x4f   : > { %p1344_p13 = pnand %p1343_p6, %p1337_p12 }
  0x51   : > { %1347 = shalt.err (!%p1344_p13)
}
  0x52   : > { %s1859_s16 = smov 8   ;;  %s1860_s20 = smov 128  }
  0x53   : > { %1204 = dma.hbm_to_vmem [thread:$0]  (!%p1575_p0), %s1636_s23, 512, %s1639_s28, %s1649_s1, %s1860_s20, %s1860_s20, %s1859_s16  }
  0x54   : > { %s207_s10 = scalar_lea.vmem [#allocation7], %s1568_s29  ;;  %s1348_s22 = scalar_lea.hbm %s1645_s19, 512 }
  0x55   : > { %s215_s5 = sshll.u32 %s207_s10, 4  ;;  %p1349_p11 = scmp.ne.s32.totalorder %s1645_s19, %s1348_s22  ;;  %s1677_s5 = int_to_ptr.vmem [resolvable:$true] %s215_s5 }
  0x56   : > { %s1353_s6 = scalar_lea.hbm %s1833_s2, 1024  ;;  %p1354_p5 = scmp.lt.u32.totalorder %s1645_s19, %s1833_s2 }
  0x57   : > { %p1351_p2 = pnand %p1349_p11, %p1597_p4  ;;  %p1355_p7 = scmp.lt.u32.totalorder %s1353_s6, %s1348_s22 }
  0x58   : > { %p1357_p8 = scmp.lt.u32.totalorder %s1348_s22, %s1645_s19 }
  0x59   : > { %p1352_p3 = pneg %p1351_p2  ;;  %p1356_p10 = por %p1355_p7, %p1354_p5 }
  0x5b   : > { %p1358_p9 = por %p1357_p8, %p1356_p10 }
  0x5d   : > { %p1359_p12 = pnand %p1358_p9, %p1352_p3 }
  0x5f   : > { %1362 = shalt.err (!%p1359_p12)
}
  0x60   : > { %s1363_s1 = scalar_lea.vmem %s1677_s5, 512  ;;  %s1470_s28 = smov [#allocation7]  }
  0x61   : > { %p1364_p1 = scmp.ne.s32.totalorder %s1677_s5, %s1363_s1  ;;  %s1368_s29 = sshll.u32 %s1470_s28, 4  ;;  %s1369_s29 = int_to_ptr.vmem [resolvable:$false] %s1368_s29 }
  0x62   : > { %s1370_s23 = scalar_lea.vmem %s1369_s29, 1024  ;;  %p1371_p11 = scmp.lt.s32.totalorder %s1677_s5, %s1369_s29 }
  0x63   : > { %p1366_p6 = pnand %p1364_p1, %p1597_p4  ;;  %p1372_p2 = scmp.lt.s32.totalorder %s1370_s23, %s1363_s1 }
  0x65   : > { %p1367_p13 = pneg %p1366_p6  ;;  %p1373_p5 = por %p1372_p2, %p1371_p11 }
  0x67   : > { %p1374_p7 = pnand %p1373_p5, %p1367_p13 }
  0x69   : > { %1377 = shalt.err (!%p1374_p7)
}
  0x6a   : > { %1210 = dma.hbm_to_vmem [thread:$0]  (!%p1575_p0), %s1645_s19, 512, %s1677_s5, %s1591_s11, %s1860_s20, %s1860_s20, %s1859_s16  }
  0x6b   : > { %p1861_p4 = scmp.ne.s32.totalorder %s1857_s9, 0 }
  0x6c   : > { %s1707_s21 = sand.u32 (!%p1861_p4), 1, %s1448_s13   ;;  %p1862_p3 = scmp.ne.s32.totalorder (!%p1861_p4), %s1848_s24, 0 }
  0x6d   : > { %227 = sbr.rel (%p1861_p4) target bundleno = 848 (0x350), region = 32  ;;  %s1710_s10 = sshll.u32 (!%p1861_p4), %s1707_s21, 5 }
  0x6e   : > { %s230_s4 = scalar_lea.sflag (!%p1861_p4), [#allocation3], %s1707_s21  ;;  %s233_s22 = scalar_lea.vmem (!%p1861_p4), [#allocation2], %s1710_s10 }
  0x74   : > { %1431 = dma.done.wait (%p1862_p3), %s230_s4, 512  }
  0x75   : > { %1433 = vsyncadd (%p1862_p3), %s230_s4, 4294966784  ;;  %s238_s11 = sand.u32 1, %s1528_s18   ;;  %s242_s9 = scalar_lea.vmem [#allocation5], %s1710_s10 }
  0x76   : > { %s239_s19 = scalar_lea.sflag [#allocation6], %s238_s11 }
  0x77   : > { %1435 = dma.done.wait (%p1862_p3), %s239_s19, 1024  }
  0x78   : > { %1437 = vsyncadd (%p1862_p3), %s239_s19, 4294966272  ;;  %v1471_v0 = vmov 0.0   ;;  %vm1472_vm0 = vmmov 0   ;;  %vm303_vm1 = vcmask 261120   ;;  %v295_v1 = vld [vmem:[%s242_s9] sm:$0xff]  ;;  %v296_v3 = vld [vmem:[%s242_s9 + $0x8] sm:$0xff] }
  0x79   : > { %1153 = vmatprep.subr.mxu0 %v1471_v0  ;;  %1155 = vmatprep.mubr.msk.f32.mxu0 %vm1472_vm0, %v1471_v0  ;;  %v287_v2 = vld [vmem:[%s233_s22] sm:$0xff]  ;;  %v288_v5 = vld [vmem:[%s233_s22 + $0x8] sm:$0xff]  ;;  %v289_v6 = vld [vmem:[%s233_s22 + $0x10] sm:$0xff]  ;;  %vm608_vm2 = vcmask 64512   ;;  %s251_s18 = scalar_lea.vmem [#allocation7], %s1710_s10  ;;  %s1117_s24 = sshll.u32 %s1707_s21, 3 }
  0x7a   : > { %1158 = vmatprep.subr.mxu1 %v1471_v0  ;;  %1160 = vmatprep.mubr.msk.f32.mxu1 %vm1472_vm0, %v1471_v0  ;;  %v291_v4 = vmul.f32 0.17677669, %v287_v2  ;;  %v297_v7 = vld [vmem:[%s242_s9 + $0x10] sm:$0xff]  ;;  %v292_v8 = vmul.f32 0.17677669, %v288_v5  ;;  %v290_v9 = vld [vmem:[%s233_s22 + $0x18] sm:$0xff] }
  0x7b   : > { %1154 = vmatpush3.xpose.msk.msra.mxu0 %vm303_vm1, %v295_v1  ;;  %1159 = vmatpush3.xpose.msk.msra.mxu1 %vm303_vm1, %v296_v3  ;;  %v298_v10 = vld [vmem:[%s242_s9 + $0x18] sm:$0xff]  ;;  %v293_v11 = vmul.f32 0.17677669, %v289_v6  ;;  %v294_v12 = vmul.f32 0.17677669, %v290_v9  ;;  %v299_v25 = vld [vmem:[%s251_s18] sm:$0xff] }
  0x7c   : > { %1163 = vmatprep.subr.mxu0 %v1471_v0  ;;  %1168 = vmatprep.subr.mxu1 %v1471_v0  ;;  %v300_v26 = vld [vmem:[%s251_s18 + $0x8] sm:$0xff]  ;;  %v301_v39 = vld [vmem:[%s251_s18 + $0x10] sm:$0xff]  ;;  %v302_v41 = vld [vmem:[%s251_s18 + $0x18] sm:$0xff]  ;;  %s1770_s16 = scalar_lea.vmem [#allocation8], %s1117_s24  ;;  %s1473_s20 = smov 32   ;;  %vm950_vm3 = vcmask 523520  }
  0x7d   : > { %s1474_s5 = smov 64   ;;  %s1475_s7 = smov 96   ;;  %vm956_vm4 = vcmask 785920   ;;  %vm962_vm5 = vcmask 1048320  }
  0x7e   : > { %1156 = vmatmul.mubr.msk.f32.vlgmr.msra.gmra.mrb[0].mxu0 %vm303_vm1, %v291_v4  ;;  %1161 = vmatmul.mubr.msk.f32.vlgmr.msra.gmra.mrb[0].mxu1 %vm303_vm1, %v292_v8  ;;  %s1131_s30 = sshll.u32 %s1456_s15, 7  ;;  %s978_s6 = sshll.u32 %s1770_s16, 4  ;;  %s1783_s6 = int_to_ptr.vmem [resolvable:$true] %s978_s6 }
  0x7f   : > { %1164 = vmatpush3.xpose.msk.msra.mxu0 %vm303_vm1, %v297_v7  ;;  %1165 = vmatprep.mubr.msk.f32.mxu0 %vm1472_vm0, %v1471_v0  ;;  %s1781_s1 = scalar_lea.hbm %s1834_s3, %s1131_s30  ;;  %s965_s28 = scalar_lea.sflag [#allocation4], %s1707_s21 }
  0x80   : > { %1169 = vmatpush3.xpose.msk.msra.mxu1 %vm303_vm1, %v298_v10  ;;  %1170 = vmatprep.mubr.msk.f32.mxu1 %vm1472_vm0, %v1471_v0  ;;  %s1378_s29 = scalar_lea.vmem %s1783_s6, 128  ;;  %p1863_p10 = scmp.ne.s32.totalorder %s1849_s25, 0 }
  0x81   : > { %1173 = vmatprep.subr.mxu0 %v1471_v0  ;;  %1178 = vmatprep.subr.mxu1 %v1471_v0  ;;  %p1379_p0 = scmp.ne.s32.totalorder %s1783_s6, %s1378_s29  ;;  %s1476_s15 = smov [#allocation8]  }
  0x82   : > { %1166 = vmatmul.mubr.msk.f32.vlgmr.msra.gmra.mrb[2].mxu0 %vm303_vm1, %v293_v11  ;;  %s1382_s23 = sshll.u32 %s1476_s15, 4  ;;  %s1383_s23 = int_to_ptr.vmem [resolvable:$false] %s1382_s23 }
  0x83   : > { %1171 = vmatmul.mubr.msk.f32.vlgmr.msra.gmra.mrb[2].mxu1 %vm303_vm1, %v294_v12  ;;  %1175 = vmatprep.mubr.msk.f32.mxu0 %vm1472_vm0, %v1471_v0  ;;  %p1380_p8 = pnand %p1379_p0, %p1863_p10  ;;  %s1384_s10 = scalar_lea.vmem %s1383_s23, 256 }
  0x84   : > { %1180 = vmatprep.mubr.msk.f32.mxu1 %vm1472_vm0, %v1471_v0  ;;  %1174 = vmatpush3.msra.mxu0 %v299_v25  ;;  %p1385_p12 = scmp.lt.s32.totalorder %s1783_s6, %s1383_s23  ;;  %p1386_p1 = scmp.lt.s32.totalorder %s1384_s10, %s1378_s29 }
  0x85   : > { %1183 = vmatprep.subr.mxu0 %v1471_v0  ;;  %1179 = vmatpush3.msra.mxu1 %v300_v26  ;;  %p1381_p9 = pneg %p1380_p8 }
  0x86   : > { %1188 = vmatprep.subr.mxu1 %v1471_v0  ;;  %p1387_p6 = por %p1386_p1, %p1385_p12 }
  0x88   : > { %p1388_p13 = pnand %p1387_p6, %p1381_p9 }
 0x151   : > { %v376_v13 = vpop.f32.mrb[0].mxu0  ;;  %v452_v14 = vpop.f32.mrb[0].mxu1 }
 0x152   : > { %v1157_v15 = vpop.f32.mrb[1].mxu0  ;;  %v609_v16 = vsel %vm608_vm2, %v376_v13, -inf  ;;  %v1162_v17 = vpop.f32.mrb[1].mxu1  ;;  %v612_v18 = vsel %vm608_vm2, %v452_v14, -inf }
 0x153   : > { %610 = vmax.xlane.f32.xlu0 %v609_v16 }
 0x155   : > { %v528_v19 = vpop.f32.mrb[2].mxu0 }
 0x156   : > { %v1167_v20 = vpop.f32.mrb[3].mxu0  ;;  %v615_v21 = vsel %vm608_vm2, %v528_v19, -inf  ;;  %v604_v22 = vpop.f32.mrb[2].mxu1 }
 0x157   : > { %613 = vmax.xlane.f32.xlu0 %v612_v18  ;;  %616 = vmax.xlane.f32.xlu1 %v615_v21  ;;  %v1172_v23 = vpop.f32.mrb[3].mxu1  ;;  %v618_v24 = vsel %vm608_vm2, %v604_v22, -inf }
 0x15b   : > { %619 = vmax.xlane.f32.xlu1 %v618_v24 }
 0x1e0   : > { %v611_v27 = vpop.xlane.xlu0 %610 }
 0x1e1   : > { %v621_v28 = vsub.f32 %v376_v13, %v611_v27 }
 0x1e3   : > { %v625_v29 = vmul.f32 1.442695, %v621_v28 }
 0x1e4   : > { %v614_v30 = vpop.xlane.xlu0 %613  ;;  %v617_v31 = vpop.xlane.xlu1 %616 }
 0x1e5   : > { %1272 = vpow2.f32 %v625_v29  ;;  %v622_v32 = vsub.f32 %v452_v14, %v614_v30  ;;  %v623_v33 = vsub.f32 %v528_v19, %v617_v31 }
 0x1e7   : > { %v627_v34 = vmul.f32 1.442695, %v622_v32  ;;  %v629_v35 = vmul.f32 1.442695, %v623_v33 }
 0x1e8   : > { %v620_v36 = vpop.xlane.xlu1 %619 }
 0x1e9   : > { %1274 = vpow2.f32 %v627_v34  ;;  %v624_v37 = vsub.f32 %v604_v22, %v620_v36 }
 0x1ea   : > { %1276 = vpow2.f32 %v629_v35 }
 0x1eb   : > { %v631_v38 = vmul.f32 1.442695, %v624_v37 }
 0x1ed   : > { %1278 = vpow2.f32 %v631_v38 }
 0x1ef   : > { %v1273_v40 = vpop.eup %1272 }
 0x1f0   : > { %1176 = vmatmul.mubr.msk.f32.vlgmr.msra.gmra.mrb[4].mxu0 %vm608_vm2, %v1273_v40  ;;  %v633_v48 = vsel %vm608_vm2, %v1273_v40, 0.0 }
 0x1f1   : > { %1184 = vmatpush3.msra.mxu0 %v301_v39  ;;  %1185 = vmatprep.mubr.msk.f32.mxu0 %vm1472_vm0, %v1471_v0 }
 0x1f3   : > { %v1275_v42 = vpop.eup %1274 }
 0x1f4   : > { %v1277_v43 = vpop.eup %1276  ;;  %1181 = vmatmul.mubr.msk.f32.vlgmr.msra.gmra.mrb[4].mxu1 %vm608_vm2, %v1275_v42  ;;  %v636_v44 = vsel %vm608_vm2, %v1275_v42, 0.0 }
 0x1f5   : > { %1186 = vmatmul.mubr.msk.f32.vlgmr.msra.gmra.mrb[6].mxu0 %vm608_vm2, %v1277_v43  ;;  %1189 = vmatpush3.msra.mxu1 %v302_v41  ;;  %v639_v45 = vsel %vm608_vm2, %v1277_v43, 0.0 }
 0x1f6   : > { %637 = vadd.xlane.f32.xlu0 %v636_v44  ;;  %640 = vadd.xlane.f32.xlu1 %v639_v45 }
 0x1f7   : > { %v1279_v46 = vpop.eup %1278  ;;  %1190 = vmatprep.mubr.msk.f32.mxu1 %vm1472_vm0, %v1471_v0 }
 0x1f8   : > { %1191 = vmatmul.mubr.msk.f32.vlgmr.msra.gmra.mrb[6].mxu1 %vm608_vm2, %v1279_v46  ;;  %v642_v47 = vsel %vm608_vm2, %v1279_v46, 0.0 }
 0x1fa   : > { %634 = vadd.xlane.f32.xlu1 %v633_v48  ;;  %643 = vadd.xlane.f32.xlu0 %v642_v47 }
 0x283   : > { %v641_v49 = vpop.xlane.xlu1 %640  ;;  %v638_v51 = vpop.xlane.xlu0 %637 }
 0x287   : > { %v635_v50 = vpop.xlane.xlu1 %634  ;;  %v644_v52 = vpop.xlane.xlu0 %643 }
 0x288   : > { %1280 = vrcp.f32 %v635_v50 }
 0x289   : > { %1282 = vrcp.f32 %v638_v51 }
 0x28a   : > { %1284 = vrcp.f32 %v641_v49 }
 0x28b   : > { %1286 = vrcp.f32 %v644_v52 }
 0x292   : > { %v1281_v53 = vpop.eup %1280 }
 0x293   : > { %v1283_v57 = vpop.eup %1282 }
 0x294   : > { %v1285_v59 = vpop.eup %1284 }
 0x295   : > { %v1287_v1 = vpop.eup %1286 }
 0x2c3   : > { %v714_v54 = vpop.f32.mrb[4].mxu0 }
 0x2c4   : > { %v941_v55 = vmul.f32 %v1281_v53, %v714_v54  ;;  %v1177_v56 = vpop.f32.mrb[5].mxu0 }
 0x2c6   : > { %945 = vst.msk [vmem:[%s1770_s16] sm:$0xff] %vm303_vm1, %v941_v55 }
 0x2c7   : > { %v787_v58 = vpop.f32.mrb[4].mxu1 }
 0x2c8   : > { %v942_v60 = vmul.f32 %v1283_v57, %v787_v58  ;;  %v860_v61 = vpop.f32.mrb[6].mxu0  ;;  %v1182_v62 = vpop.f32.mrb[5].mxu1 }
 0x2c9   : > { %v943_v63 = vmul.f32 %v1285_v59, %v860_v61  ;;  %v1187_v0 = vpop.f32.mrb[7].mxu0 }
 0x2ca   : > { %947 = vrot.lane.b32.xlu0 %v942_v60, %s1473_s20 }
 0x2cb   : > { %953 = vrot.lane.b32.xlu1 %v943_v63, %s1474_s5  ;;  %v933_v2 = vpop.f32.mrb[6].mxu1 }
 0x2cc   : > { %v944_v3 = vmul.f32 %v1287_v1, %v933_v2  ;;  %v1192_v4 = vpop.f32.mrb[7].mxu1 }
 0x2cf   : > { %959 = vrot.lane.b32.xlu1 %v944_v3, %s1475_s7 }
 0x33c   : > { %v948_v5 = vpop.permute.xlu0 %947 }
 0x33d   : > { %951 = vst.msk [vmem:[%s1770_s16] sm:$0xff] %vm950_vm3, %v948_v5  ;;  %v954_v6 = vpop.permute.xlu1 %953 }
 0x33e   : > { %957 = vst.msk [vmem:[%s1770_s16] sm:$0xff] %vm956_vm4, %v954_v6 }
 0x341   : > { %v960_v7 = vpop.permute.xlu1 %959 }
 0x342   : > { %963 = vst.msk [vmem:[%s1770_s16] sm:$0xff] %vm962_vm5, %v960_v7 }
 0x343   : > { %1391 = shalt.err (!%p1388_p13)
}
 0x344   : > { %s1392_s21 = scalar_lea.hbm %s1781_s1, 128  ;;  %s1396_s11 = scalar_lea.hbm %s1834_s3, 256 }
 0x345   : > { %p1393_p11 = scmp.ne.s32.totalorder %s1781_s1, %s1392_s21  ;;  %p1397_p7 = scmp.lt.u32.totalorder %s1781_s1, %s1834_s3 }
 0x346   : > { %p1398_p4 = scmp.lt.u32.totalorder %s1396_s11, %s1392_s21  ;;  %p1400_p0 = scmp.lt.u32.totalorder %s1392_s21, %s1781_s1 }
 0x347   : > { %p1394_p2 = pnand %p1393_p11, %p1863_p10 }
 0x348   : > { %p1399_p3 = por %p1398_p4, %p1397_p7 }
 0x349   : > { %p1395_p5 = pneg %p1394_p2 }
 0x34a   : > { %p1401_p8 = por %p1400_p0, %p1399_p3 }
 0x34c   : > { %p1402_p9 = pnand %p1401_p8, %p1395_p5 }
 0x34e   : > { %1405 = shalt.err (!%p1402_p9)
}
 0x34f   : > { %1199 = dma.vmem_to_hbm [thread:$0]  (%p1863_p10), %s1783_s6, 128, %s1781_s1, %s965_s28  }
 0x350 PF: > { %s990_s18 = sand.u32 1, %s1444_s12   ;;  %p1864_p12 = scmp.ne.s32.totalorder %s1851_s27, 0 }
 0x351   : > { %p1865_p1 = scmp.ge.s32.totalorder %s1464_s17, 2  ;;  %s991_s24 = scalar_lea.sflag [#allocation4], %s990_s18 }
 0x353   : > { %p1212_p6 = pnand %p1865_p1, %p1864_p12 }
 0x355   : > { %1439 = dma.done.wait (!%p1212_p6), %s991_s24, 128  }
 0x356   : > { %1441 = vsyncadd (!%p1212_p6), %s991_s24, 4294967168  ;;  %s22_s17 = sadd.s32 1, %s1464_s17   ;;  %s1866_s25 = sld [smem:[#allocation14_spill]] }
 0x357   : > { %p19_p13 = scmp.ge.s32.totalorder %s22_s17, 4   ;;  %s1867_s15 = sld [smem:[#allocation12_spill]] }
 0x358   : > { %s1868_s16 = sld [smem:[#allocation13_spill]]  ;;  %s1869_s12 = smov %s1448_s13 }
 0x359   : > { %s1870_s13 = smov %s1452_s14  ;;  %21 = sbr.rel (!%p19_p13) target bundleno = 10 (0xa), region = 101 }
 0x35c   : > { %s1871_s14 = smov %s1866_s25 }
 0x360   :  { %996 = vsyncpa [#allocation3], 1 }
 0x361   :  { %998 = vsyncpa [#allocation3 + $0x1], 1 }
 0x362   :  { %999 = vsyncpa [#allocation6], 1 }
 0x363   :  { %1001 = vsyncpa [#allocation6 + $0x1], 1 }
 0x364   :  { %1002 = vsyncpa [#allocation4], 1 }
 0x365   :  { %1004 = vsyncpa [#allocation4 + $0x1], 1 }

</bundles_post_ra>
